<compile_context>
chip_gen: v6e
topology: v6e:2x2x1
jax: 0.10.0
libtpu: 0.0.40
codegen_flags: <defaults>
</compile_context>

<pallas_src>
import math
import numpy as np
import jax
import jax.numpy as jnp
from jax import lax
from jax.experimental import pallas as pl

# ------------------------- module hyper-parameters -------------------------
B = 2
C_IN = 4
C_OUT = 8
H = W = 16
EXPAND = 1.0
KERNEL_SIZE = 3
N_GROUPS = 2
DOWNSAMPLE = 2          # downsample_ratio
STRIDE = 1
CHANNEL_DIVISIBLE = 8   # MyNetwork.CHANNEL_DIVISIBLE
BN_EPS = 1e-5


def make_divisible(v, divisor=8, min_val=None):
    if min_val is None:
        min_val = divisor
    new_v = max(min_val, int(v + divisor / 2) // divisor * divisor)
    if new_v < 0.9 * v:
        new_v += divisor
    return new_v


NUM_MID = make_divisible(int(C_IN * EXPAND), CHANNEL_DIVISIBLE)   # = 8
HP, WP = H // DOWNSAMPLE, W // DOWNSAMPLE                          # pooled spatial
S = H * W                                                          # full spatial (flat)
SP = HP * WP                                                       # pooled spatial (flat)
PAD = KERNEL_SIZE // 2                                             # get_same_padding(3)
KK = KERNEL_SIZE * KERNEL_SIZE                                     # number of conv taps
BC_IN = B * C_IN
BC_OUT = B * C_OUT
BM = B * NUM_MID


# --------------------------- linear-operator glue ---------------------------
def _pool_tap_1d(full, pooled, ratio, k, pad, stride):
    """mats[d] (pooled, full): avg-pool(ratio) followed by conv tap offset d ('same' pad)."""
    mats = []
    for d in range(k):
        A = np.zeros((pooled, full), np.float32)
        for p in range(pooled):
            a = p * stride + d - pad
            if 0 <= a < pooled:
                for r in range(ratio):
                    A[p, a * ratio + r] = 1.0 / ratio
        mats.append(A)
    return mats


def _bilinear_1d(out_size, in_size):
    """PyTorch F.upsample(mode='bilinear', align_corners=False) as a matrix."""
    U = np.zeros((out_size, in_size), np.float32)
    scale = in_size / out_size
    for i in range(out_size):
        src = max((i + 0.5) * scale - 0.5, 0.0)
        i0 = min(int(math.floor(src)), in_size - 1)
        i1 = i0 + 1 if i0 < in_size - 1 else i0
        lam = src - i0
        U[i, i0] += 1.0 - lam
        U[i, i1] += lam
    return U


def _round_bf16(a):
    # keep parameter / input values exactly representable in bf16 so the kernel's
    # bf16 operand path matches the f32 reference within tight tolerance.
    return jnp.asarray(a).astype(jnp.bfloat16).astype(jnp.float32)


# ------------------------------- parameters --------------------------------
def build_params(key):
    k1, k2, k3 = jax.random.split(key, 3)
    # init_models 'he_fout': conv1 n = k*k*out_channels
    std1 = math.sqrt(2.0 / (KERNEL_SIZE * KERNEL_SIZE * NUM_MID))
    w_conv1 = std1 * jax.random.normal(
        k1, (NUM_MID, C_IN // N_GROUPS, KERNEL_SIZE, KERNEL_SIZE), jnp.float32)
    # conv2 (1x1): n = 1*1*out_channels
    std2 = math.sqrt(2.0 / C_OUT)
    w_conv2 = std2 * jax.random.normal(k2, (C_OUT, NUM_MID, 1, 1), jnp.float32)
    # TODO(synk): main_branch is an arbitrary sub-module passed to __init__;
    # stand-in here is a bias-free 1x1 conv (he_fout init).
    stdm = math.sqrt(2.0 / C_OUT)
    w_main = stdm * jax.random.normal(k3, (C_OUT, C_IN, 1, 1), jnp.float32)

    # BatchNorms (eval-mode running stats mean=0, var=1).
    # final_bn.weight is zero-initialised by LiteResidualModule.__init__.
    return dict(
        w_conv1=_round_bf16(w_conv1), w_conv2=_round_bf16(w_conv2),
        w_main=_round_bf16(w_main),
        bn1_gamma=jnp.ones((NUM_MID,), jnp.float32),
        bn1_beta=jnp.zeros((NUM_MID,), jnp.float32),
        fbn_gamma=jnp.zeros((C_OUT,), jnp.float32),
        fbn_beta=jnp.zeros((C_OUT,), jnp.float32),
    )


def prepare_kernel_operands(params, final_gamma=None):
    """Host-side folding of pooling/taps/upsample into dense operators and BN into weights."""
    w1 = np.asarray(params["w_conv1"])                         # (NUM_MID, C_IN//G, 3, 3)
    w2 = np.asarray(params["w_conv2"])[:, :, 0, 0]             # (C_OUT, NUM_MID)
    wm = np.asarray(params["w_main"])[:, :, 0, 0]              # (C_OUT, C_IN)
    g1 = np.asarray(params["bn1_gamma"])
    bb1 = np.asarray(params["bn1_beta"])
    fg = np.asarray(params["fbn_gamma"] if final_gamma is None else final_gamma)
    fb = np.asarray(params["fbn_beta"])
    # eval-mode BN folds: scale = gamma / sqrt(var + eps), bias = beta - mean*scale
    # (running_mean=0, running_var=1 here)
    s1 = (g1 / np.sqrt(1.0 + BN_EPS)).astype(np.float32)
    s2 = (fg / np.sqrt(1.0 + BN_EPS)).astype(np.float32)

    # grouped 3x3 conv: per-tap dense (NUM_MID, C_IN) with group-block structure,
    # BN1 scale folded into the output rows.
    cin_g, mid_g = C_IN // N_GROUPS, NUM_MID // N_GROUPS
    w1_full = np.zeros((KK, NUM_MID, C_IN), np.float32)
    for g in range(N_GROUPS):
        for dy in range(KERNEL_SIZE):
            for dx in range(KERNEL_SIZE):
                t = dy * KERNEL_SIZE + dx
                w1_full[t, g * mid_g:(g + 1) * mid_g, g * cin_g:(g + 1) * cin_g] = \
                    w1[g * mid_g:(g + 1) * mid_g, :, dy, dx]
    w1_full = w1_full * s1[None, :, None]

    # tap/channel contraction weight, block-diagonal over batch:
    # w1r[b*MID+m, t*(B*C_IN) + b*C_IN + c] = s1[m] * w1[t, m, c]
    w1r = np.zeros((BM, KK * BC_IN), np.float32)
    for b in range(B):
        for t in range(KK):
            w1r[b * NUM_MID:(b + 1) * NUM_MID,
                t * BC_IN + b * C_IN: t * BC_IN + (b + 1) * C_IN] = w1_full[t]

    # avgpool(2) + 3x3 'same' conv taps collapsed into one (S, 9*SP) right-operand
    ah = _pool_tap_1d(H, HP, DOWNSAMPLE, KERNEL_SIZE, PAD, STRIDE)
    aw = _pool_tap_1d(W, WP, DOWNSAMPLE, KERNEL_SIZE, PAD, STRIDE)
    t_all = np.concatenate(
        [np.kron(ah[dy], aw[dx]).T for dy in range(KERNEL_SIZE) for dx in range(KERNEL_SIZE)],
        axis=1).astype(np.float32)                              # (S, KK*SP)

    # bilinear upsample (align_corners=False) as a right-operand (SP, S)
    u_t = np.kron(_bilinear_1d(H, HP), _bilinear_1d(W, WP)).T.astype(np.float32)

    # block-diagonal (over batch) channel mixers; final-BN scale folded into conv2 rows
    wm_bd = np.kron(np.eye(B, dtype=np.float32), wm).astype(np.float32)            # (BC_OUT, BC_IN)
    w2s_bd = np.kron(np.eye(B, dtype=np.float32), s2[:, None] * w2).astype(np.float32)  # (BC_OUT, BM)

    # the two remaining biases, as per-row (sublane) columns broadcast over lanes
    b1c = np.tile(bb1, B).reshape(BM, 1).astype(np.float32)
    b2c = np.tile(fb, B).reshape(BC_OUT, 1).astype(np.float32)

    # big spatial operators in bf16 (values {0, .25, .75, 1} are exactly representable)
    return (jnp.asarray(t_all, jnp.bfloat16), jnp.asarray(w1r),
            jnp.asarray(wm_bd), jnp.asarray(w2s_bd),
            jnp.asarray(u_t, jnp.bfloat16), jnp.asarray(b1c), jnp.asarray(b2c))


# --------------------------------- kernel -----------------------------------
def _lite_residual_kernel(x_ref, tall_ref, w1r_ref, wm_ref, w2_ref, ut_ref,
                          b1_ref, b2_ref, o_ref):
    x = x_ref[...]                                                        # (B*C_IN, S) f32
    # main branch (stand-in bias-free 1x1 conv), block-diagonal over batch
    main = jnp.dot(wm_ref[...], x, preferred_element_type=jnp.float32)    # (B*C_OUT, S)

    # lite residual: avgpool + grouped 3x3 'same' conv collapsed into two matmuls
    xt = jnp.dot(x.astype(jnp.bfloat16), tall_ref[...],
                 preferred_element_type=jnp.float32)                      # (B*C_IN, KK*SP)
    # move the 9 tap blocks from lanes onto sublanes (tiny: 9 x (8,64) tiles)
    flat = jnp.concatenate([xt[:, t * SP:(t + 1) * SP] for t in range(KK)],
                           axis=0)                                        # (KK*B*C_IN, SP)
    acc = jnp.dot(w1r_ref[...], flat, preferred_element_type=jnp.float32)  # (B*MID, SP)

    y = jnp.maximum(acc + b1_ref[...], 0.0)                               # BN1 (scale folded) + ReLU
    y2 = jnp.dot(w2_ref[...], y, preferred_element_type=jnp.float32) \
        + b2_ref[...]                                                     # 1x1 conv2 + final_BN
    up = jnp.dot(y2.astype(jnp.bfloat16), ut_ref[...],
                 preferred_element_type=jnp.float32)                      # bilinear upsample (B*C_OUT, S)

    o_ref[...] = main + up


def lite_residual_forward(x_nchw, operands):
    t_all, w1r, wm_bd, w2s_bd, u_t, b1c, b2c = operands
    # NCHW -> (B*C_IN, H*W): a pure reshape, channels(+batch) on sublanes, spatial on lanes
    x2 = x_nchw.astype(jnp.float32).reshape(BC_IN, S)
    args = (x2, t_all, w1r, wm_bd, w2s_bd, u_t, b1c, b2c)

    flops = 2 * (BC_OUT * BC_IN * S            # main 1x1 conv
                 + BC_IN * S * KK * SP         # pooled conv taps
                 + BM * (KK * BC_IN) * SP      # tap/channel contraction
                 + BC_OUT * BM * SP            # 1x1 conv2
                 + BC_OUT * SP * S)            # bilinear upsample
    bytes_accessed = sum(int(a.size) * a.dtype.itemsize for a in args) + BC_OUT * S * 4

    out = pl.pallas_call(
        _lite_residual_kernel,
        out_shape=jax.ShapeDtypeStruct((BC_OUT, S), jnp.float32),
        cost_estimate=pl.CostEstimate(flops=flops, transcendentals=0,
                                      bytes_accessed=bytes_accessed),
    )(*args)
    return out.reshape(B, C_OUT, H, W)                                    # back to NCHW (pure reshape)


# ----------------------------- pure-JAX reference ----------------------------
def reference_forward(x_nchw, params, final_gamma_override=None):
    dn = ("NCHW", "OIHW", "NCHW")
    s1 = (params["bn1_gamma"] / jnp.sqrt(1.0 + BN_EPS)).reshape(1, -1, 1, 1)
    b1 = params["bn1_beta"].reshape(1, -1, 1, 1)
    fg = params["fbn_gamma"] if final_gamma_override is None else final_gamma_override
    s2 = (fg / jnp.sqrt(1.0 + BN_EPS)).reshape(1, -1, 1, 1)
    b2 = params["fbn_beta"].reshape(1, -1, 1, 1)

    xp = x_nchw.reshape(B, C_IN, HP, DOWNSAMPLE, WP, DOWNSAMPLE).mean(axis=(3, 5))
    y = lax.conv_general_dilated(xp, params["w_conv1"], (STRIDE, STRIDE),
                                 [(PAD, PAD), (PAD, PAD)],
                                 feature_group_count=N_GROUPS, dimension_numbers=dn)
    y = jnp.maximum(y * s1 + b1, 0.0)
    y = lax.conv_general_dilated(y, params["w_conv2"], (1, 1), [(0, 0), (0, 0)],
                                 dimension_numbers=dn)
    y = y * s2 + b2
    uh = jnp.asarray(_bilinear_1d(H, HP))
    uw = jnp.asarray(_bilinear_1d(W, WP))
    y = jnp.einsum("hp,wq,bcpq->bchw", uh, uw, y)
    main = lax.conv_general_dilated(x_nchw, params["w_main"], (1, 1), [(0, 0), (0, 0)],
                                    dimension_numbers=dn)
    return main + y


# ----------------------------------- main ------------------------------------
if __name__ == "__main__":
    key = jax.random.PRNGKey(0)
    kp, kx = jax.random.split(key)
    params = build_params(kp)
    # bf16-representable test input (PyTorch-convention NCHW)
    x = _round_bf16(jax.random.normal(kx, (B, C_IN, H, W), jnp.float32))

    # faithful forward: final_bn gamma == 0 per __init__ -> residual contributes zero
    ops = prepare_kernel_operands(params)
    out = jax.block_until_ready(lite_residual_forward(x, ops))
    ref = reference_forward(x, params)
    np.testing.assert_allclose(np.asarray(out), np.asarray(ref), atol=1e-2, rtol=1e-2)

    # extra sanity check that exercises the full residual path (gamma = 1 instead of 0);
    # looser tolerance because the residual path uses bf16 operands on the MXU.
    gamma1 = jnp.ones((C_OUT,), jnp.float32)
    ops2 = prepare_kernel_operands(params, final_gamma=gamma1)
    out2 = jax.block_until_ready(lite_residual_forward(x, ops2))
    ref2 = reference_forward(x, params, final_gamma_override=gamma1)
    np.testing.assert_allclose(np.asarray(out2), np.asarray(ref2), atol=2e-2, rtol=2e-2)

    print("KERNEL_OK")
</pallas_src>

<mosaic_0001>
module attributes {stable_mosaic.version = 11 : i64} {
  func.func @_lite_residual_kernel(%arg0: memref<8x256xf32, #tpu.memory_space<vmem>>, %arg1: memref<256x576xbf16, #tpu.memory_space<vmem>>, %arg2: memref<16x72xf32, #tpu.memory_space<vmem>>, %arg3: memref<16x8xf32, #tpu.memory_space<vmem>>, %arg4: memref<16x16xf32, #tpu.memory_space<vmem>>, %arg5: memref<64x256xbf16, #tpu.memory_space<vmem>>, %arg6: memref<16x1xf32, #tpu.memory_space<vmem>>, %arg7: memref<16x1xf32, #tpu.memory_space<vmem>>, %arg8: memref<16x256xf32, #tpu.memory_space<vmem>>) attributes {dimension_semantics = [], scalar_prefetch = 0 : i64, scratch_operands = 0 : i64, tpu.core_type = #tpu.core_type<tc>} {
    %c0 = arith.constant 0 : index
    %c0_0 = arith.constant 0 : index
    %0 = vector.load %arg0[%c0, %c0_0] : memref<8x256xf32, #tpu.memory_space<vmem>>, vector<8x256xf32>
    %c0_1 = arith.constant 0 : index
    %c0_2 = arith.constant 0 : index
    %1 = vector.load %arg3[%c0_1, %c0_2] : memref<16x8xf32, #tpu.memory_space<vmem>>, vector<16x8xf32>
    %cst = arith.constant dense<0.000000e+00> : vector<16x256xf32>
    %2 = tpu.matmul %1, %0, %cst {dimension_numbers = #tpu.dot_dimension_numbers<[1], [0], [0], [1], [0, 0, 1, 1], [], []>} : vector<16x8xf32>, vector<8x256xf32>, vector<16x256xf32> -> vector<16x256xf32>
    %3 = arith.truncf %0 : vector<8x256xf32> to vector<8x256xbf16>
    %c0_3 = arith.constant 0 : index
    %c0_4 = arith.constant 0 : index
    %4 = vector.load %arg1[%c0_3, %c0_4] : memref<256x576xbf16, #tpu.memory_space<vmem>>, vector<256x576xbf16>
    %cst_5 = arith.constant dense<0.000000e+00> : vector<8x576xf32>
    %5 = tpu.matmul %3, %4, %cst_5 {dimension_numbers = #tpu.dot_dimension_numbers<[1], [0], [0], [1], [0, 0, 1, 1], [], []>} : vector<8x256xbf16>, vector<256x576xbf16>, vector<8x576xf32> -> vector<8x576xf32>
    %6 = vector.extract_strided_slice %5 {offsets = [0, 0], sizes = [8, 64], strides = [1, 1]} : vector<8x576xf32> to vector<8x64xf32>
    %7 = vector.extract_strided_slice %5 {offsets = [0, 64], sizes = [8, 64], strides = [1, 1]} : vector<8x576xf32> to vector<8x64xf32>
    %8 = vector.extract_strided_slice %5 {offsets = [0, 128], sizes = [8, 64], strides = [1, 1]} : vector<8x576xf32> to vector<8x64xf32>
    %9 = vector.extract_strided_slice %5 {offsets = [0, 192], sizes = [8, 64], strides = [1, 1]} : vector<8x576xf32> to vector<8x64xf32>
    %10 = vector.extract_strided_slice %5 {offsets = [0, 256], sizes = [8, 64], strides = [1, 1]} : vector<8x576xf32> to vector<8x64xf32>
    %11 = vector.extract_strided_slice %5 {offsets = [0, 320], sizes = [8, 64], strides = [1, 1]} : vector<8x576xf32> to vector<8x64xf32>
    %12 = vector.extract_strided_slice %5 {offsets = [0, 384], sizes = [8, 64], strides = [1, 1]} : vector<8x576xf32> to vector<8x64xf32>
    %13 = vector.extract_strided_slice %5 {offsets = [0, 448], sizes = [8, 64], strides = [1, 1]} : vector<8x576xf32> to vector<8x64xf32>
    %14 = vector.extract_strided_slice %5 {offsets = [0, 512], sizes = [8, 64], strides = [1, 1]} : vector<8x576xf32> to vector<8x64xf32>
    %15 = tpu.concatenate %6, %7, %8, %9, %10, %11, %12, %13, %14 in 0 : vector<8x64xf32>, vector<8x64xf32>, vector<8x64xf32>, vector<8x64xf32>, vector<8x64xf32>, vector<8x64xf32>, vector<8x64xf32>, vector<8x64xf32>, vector<8x64xf32> -> vector<72x64xf32>
    %c0_6 = arith.constant 0 : index
    %c0_7 = arith.constant 0 : index
    %16 = vector.load %arg2[%c0_6, %c0_7] : memref<16x72xf32, #tpu.memory_space<vmem>>, vector<16x72xf32>
    %cst_8 = arith.constant dense<0.000000e+00> : vector<16x64xf32>
    %17 = tpu.matmul %16, %15, %cst_8 {dimension_numbers = #tpu.dot_dimension_numbers<[1], [0], [0], [1], [0, 0, 1, 1], [], []>} : vector<16x72xf32>, vector<72x64xf32>, vector<16x64xf32> -> vector<16x64xf32>
    %c0_9 = arith.constant 0 : index
    %c0_10 = arith.constant 0 : index
    %18 = vector.load %arg6[%c0_9, %c0_10] : memref<16x1xf32, #tpu.memory_space<vmem>>, vector<16x1xf32>
    %19 = vector.broadcast %18 : vector<16x1xf32> to vector<16x64xf32>
    %20 = arith.addf %17, %19 : vector<16x64xf32>
    %cst_11 = arith.constant 0.000000e+00 : f32
    %21 = vector.broadcast %cst_11 : f32 to vector<16x64xf32>
    %22 = arith.maximumf %20, %21 : vector<16x64xf32>
    %c0_12 = arith.constant 0 : index
    %c0_13 = arith.constant 0 : index
    %23 = vector.load %arg4[%c0_12, %c0_13] : memref<16x16xf32, #tpu.memory_space<vmem>>, vector<16x16xf32>
    %cst_14 = arith.constant dense<0.000000e+00> : vector<16x64xf32>
    %24 = tpu.matmul %23, %22, %cst_14 {dimension_numbers = #tpu.dot_dimension_numbers<[1], [0], [0], [1], [0, 0, 1, 1], [], []>} : vector<16x16xf32>, vector<16x64xf32>, vector<16x64xf32> -> vector<16x64xf32>
    %c0_15 = arith.constant 0 : index
    %c0_16 = arith.constant 0 : index
    %25 = vector.load %arg7[%c0_15, %c0_16] : memref<16x1xf32, #tpu.memory_space<vmem>>, vector<16x1xf32>
    %26 = vector.broadcast %25 : vector<16x1xf32> to vector<16x64xf32>
    %27 = arith.addf %24, %26 : vector<16x64xf32>
    %28 = arith.truncf %27 : vector<16x64xf32> to vector<16x64xbf16>
    %c0_17 = arith.constant 0 : index
    %c0_18 = arith.constant 0 : index
    %29 = vector.load %arg5[%c0_17, %c0_18] : memref<64x256xbf16, #tpu.memory_space<vmem>>, vector<64x256xbf16>
    %cst_19 = arith.constant dense<0.000000e+00> : vector<16x256xf32>
    %30 = tpu.matmul %28, %29, %cst_19 {dimension_numbers = #tpu.dot_dimension_numbers<[1], [0], [0], [1], [0, 0, 1, 1], [], []>} : vector<16x64xbf16>, vector<64x256xbf16>, vector<16x256xf32> -> vector<16x256xf32>
    %31 = arith.addf %2, %30 : vector<16x256xf32>
    %c0_20 = arith.constant 0 : index
    %c0_21 = arith.constant 0 : index
    %32 = vector.load %arg8[%c0_20, %c0_21] : memref<16x256xf32, #tpu.memory_space<vmem>>, vector<16x256xf32>
    tpu.vector_store %arg8[%c0_20, %c0_21], %31 {strides = array<i32>} : memref<16x256xf32, #tpu.memory_space<vmem>>, vector<16x256xf32>,
    return
  }
}

</mosaic_0001>

<bundles_post_ra>
// kernel: tpu_custom_call.1
= control target key start
LH: loop header
LB: loop body
LE: loop exit
PB: predicated region body
PF: predicated region fallthrough
CT: control target
= control target key end

     0   :  { %s1761_s0 = inlined_call_operand.vmem [shape: f32[8,256], index: 0, kind: input, shape index: {}]   ;;  %s1762_s1 = inlined_call_operand.vmem [shape: bf16[256,576], index: 1, kind: input, shape index: {}]   ;;  %s1763_s2 = inlined_call_operand.vmem [shape: f32[16,72], index: 2, kind: input, shape index: {}]   ;;  %s1764_s3 = inlined_call_operand.vmem [shape: f32[16,8], index: 3, kind: input, shape index: {}]   ;;  %s1765_s4 = inlined_call_operand.vmem [shape: f32[16,16], index: 4, kind: input, shape index: {}]   ;;  %s1766_s5 = inlined_call_operand.vmem [shape: bf16[64,256], index: 5, kind: input, shape index: {}]   ;;  %s1767_s6 = inlined_call_operand.vmem [shape: f32[16,1], index: 6, kind: input, shape index: {}]   ;;  %s1768_s7 = inlined_call_operand.vmem [shape: f32[16,1], index: 7, kind: input, shape index: {}]   ;;  %s1769_s8 = inlined_call_operand.hbm [shape: f32[16,256], index: 8, kind: output, shape index: {}]  }
   0x1   :  { %v1249_v0 = vld [vmem:[%s1762_s1 + $0x124] ss:$20 sps:$4 sm:$0xff]   ;;  %v1251_v1 = vld [vmem:[%s1762_s1 + $0x120] ss:$20 sps:$4 sm:$0xff]   ;;  %v1252_v2 = vld [vmem:[%s1762_s1 + $0x11c] ss:$20 sps:$4 sm:$0xff]  }
   0x2   :  { %590 = vmatprep.subr.bf16.mxu1 %v1249_v0  ;;  %v1254_v3 = vld [vmem:[%s1762_s1 + $0x118] ss:$20 sps:$4 sm:$0xff]   ;;  %v1255_v4 = vld [vmem:[%s1762_s1 + $0xfc] ss:$20 sps:$4 sm:$0xff]   ;;  %549 = vmatprep.subr.bf16.mxu0 %v1252_v2  ;;  %v1258_v6 = vld [vmem:[%s1762_s1 + $0xf4] ss:$20 sps:$4 sm:$0xff]  }
   0x3   :  { %591 = vmatpush1.bf16.msra.mxu1 %v1251_v1  ;;  %v1257_v5 = vld [vmem:[%s1762_s1 + $0xf8] ss:$20 sps:$4 sm:$0xff]   ;;  %550 = vmatpush1.bf16.msra.mxu0 %v1254_v3  ;;  %v1260_v7 = vld [vmem:[%s1762_s1 + $0xf0] ss:$20 sps:$4 sm:$0xff]   ;;  %v1261_v8 = vld [vmem:[%s1762_s1 + $0xd4] ss:$20 sps:$4 sm:$0xff]  }
   0x4   :  { %592 = vmatprep.subr.bf16.mxu1 %v1255_v4  ;;  %551 = vmatprep.subr.bf16.mxu0 %v1258_v6  ;;  %v1263_v9 = vld [vmem:[%s1762_s1 + $0xd0] ss:$20 sps:$4 sm:$0xff]   ;;  %v1264_v10 = vld [vmem:[%s1762_s1 + $0xcc] ss:$20 sps:$4 sm:$0xff]   ;;  %v1266_v12 = vld [vmem:[%s1762_s1 + $0xc8] ss:$20 sps:$4 sm:$0xff]  }
   0x5   :  { %v1267_v11 = vld [vmem:[%s1762_s1 + $0xac] ss:$20 sps:$4 sm:$0xff]   ;;  %v1270_v13 = vld [vmem:[%s1762_s1 + $0xa4] ss:$20 sps:$4 sm:$0xff]   ;;  %v1269_v14 = vld [vmem:[%s1762_s1 + $0xa8] ss:$20 sps:$4 sm:$0xff]  }
   0x6   :  { %v1273_v15 = vld [vmem:[%s1762_s1 + $0x84] ss:$20 sps:$4 sm:$0xff]   ;;  %v1272_v16 = vld [vmem:[%s1762_s1 + $0xa0] ss:$20 sps:$4 sm:$0xff]   ;;  %v1276_v17 = vld [vmem:[%s1762_s1 + $0x7c] ss:$20 sps:$4 sm:$0xff]  }
   0x7   :  { %593 = vmatpush1.bf16.msra.mxu1 %v1257_v5  ;;  %552 = vmatpush1.bf16.msra.mxu0 %v1260_v7  ;;  %v1275_v18 = vld [vmem:[%s1762_s1 + $0x80] ss:$20 sps:$4 sm:$0xff]   ;;  %v1279_v19 = vld [vmem:[%s1762_s1 + $0x5c] ss:$20 sps:$4 sm:$0xff]   ;;  %v1278_v20 = vld [vmem:[%s1762_s1 + $0x78] ss:$20 sps:$4 sm:$0xff]  }
   0x8   :  { %594 = vmatprep.subr.bf16.mxu1 %v1261_v8  ;;  %553 = vmatprep.subr.bf16.mxu0 %v1264_v10  ;;  %v1282_v21 = vld [vmem:[%s1762_s1 + $0x54] ss:$20 sps:$4 sm:$0xff]   ;;  %v1281_v22 = vld [vmem:[%s1762_s1 + $0x58] ss:$20 sps:$4 sm:$0xff]   ;;  %v1284_v24 = vld [vmem:[%s1762_s1 + $0x50] ss:$20 sps:$4 sm:$0xff]  }
   0x9   :  { %v1285_v23 = vld [vmem:[%s1762_s1 + $0x34] ss:$20 sps:$4 sm:$0xff]   ;;  %v1288_v25 = vld [vmem:[%s1762_s1 + $0x2c] ss:$20 sps:$4 sm:$0xff]   ;;  %v1287_v26 = vld [vmem:[%s1762_s1 + $0x30] ss:$20 sps:$4 sm:$0xff]  }
   0xa   :  { %v1291_v27 = vld [vmem:[%s1762_s1 + $0xc] ss:$20 sps:$4 sm:$0xff]   ;;  %v1290_v28 = vld [vmem:[%s1762_s1 + $0x28] ss:$20 sps:$4 sm:$0xff]   ;;  %v1294_v29 = vld [vmem:[%s1762_s1 + $0x4] ss:$20 sps:$4 sm:$0xff]  }
   0xb   :  { %595 = vmatpush1.bf16.msra.mxu1 %v1263_v9  ;;  %554 = vmatpush1.bf16.msra.mxu0 %v1266_v12  ;;  %v1293_v30 = vld [vmem:[%s1762_s1 + $0x8] ss:$20 sps:$4 sm:$0xff]   ;;  %v1297_v31 = vld [vmem:[%s1762_s1 + $0x264] ss:$20 sps:$4 sm:$0xff]   ;;  %v1296_v32 = vld [vmem:[%s1762_s1] ss:$20 sps:$4 sm:$0xff]  }
   0xc   :  { %596 = vmatprep.subr.bf16.mxu1 %v1267_v11  ;;  %555 = vmatprep.subr.bf16.mxu0 %v1270_v13  ;;  %v1300_v33 = vld [vmem:[%s1762_s1 + $0x25c] ss:$20 sps:$4 sm:$0xff]   ;;  %v1299_v34 = vld [vmem:[%s1762_s1 + $0x260] ss:$20 sps:$4 sm:$0xff]   ;;  %v1302_v36 = vld [vmem:[%s1762_s1 + $0x258] ss:$20 sps:$4 sm:$0xff]  }
   0xd   :  { %v1303_v35 = vld [vmem:[%s1762_s1 + $0x23c] ss:$20 sps:$4 sm:$0xff]   ;;  %v1306_v37 = vld [vmem:[%s1762_s1 + $0x234] ss:$20 sps:$4 sm:$0xff]   ;;  %v1305_v38 = vld [vmem:[%s1762_s1 + $0x238] ss:$20 sps:$4 sm:$0xff]  }
   0xe   :  { %v1309_v39 = vld [vmem:[%s1762_s1 + $0x214] ss:$20 sps:$4 sm:$0xff]   ;;  %v1308_v40 = vld [vmem:[%s1762_s1 + $0x230] ss:$20 sps:$4 sm:$0xff]   ;;  %v1312_v41 = vld [vmem:[%s1762_s1 + $0x20c] ss:$20 sps:$4 sm:$0xff]  }
   0xf   :  { %597 = vmatpush1.bf16.msra.mxu1 %v1269_v14  ;;  %556 = vmatpush1.bf16.msra.mxu0 %v1272_v16  ;;  %v1311_v42 = vld [vmem:[%s1762_s1 + $0x210] ss:$20 sps:$4 sm:$0xff]   ;;  %v1315_v43 = vld [vmem:[%s1762_s1 + $0x1ec] ss:$20 sps:$4 sm:$0xff]   ;;  %v1314_v44 = vld [vmem:[%s1762_s1 + $0x208] ss:$20 sps:$4 sm:$0xff]  }
  0x10   :  { %598 = vmatprep.subr.bf16.mxu1 %v1273_v15  ;;  %557 = vmatprep.subr.bf16.mxu0 %v1276_v17  ;;  %v1317_v45 = vld [vmem:[%s1762_s1 + $0x1e8] ss:$20 sps:$4 sm:$0xff]   ;;  %v1318_v46 = vld [vmem:[%s1762_s1 + $0x1e4] ss:$20 sps:$4 sm:$0xff]   ;;  %v1320_v48 = vld [vmem:[%s1762_s1 + $0x1e0] ss:$20 sps:$4 sm:$0xff]  }
  0x11   :  { %v1590_v47 = vld [vmem:[%s1761_s0 + $0x8] sm:$0xff]  ;;  %v1321_v50 = vld [vmem:[%s1762_s1 + $0x1c4] ss:$20 sps:$4 sm:$0xff]   ;;  %v1323_v51 = vld [vmem:[%s1762_s1 + $0x1c0] ss:$20 sps:$4 sm:$0xff]  }
  0x12   :  { %v36_v49 = vpack.c.bf16 %v1590_v47, %v1590_v47  ;;  %v1324_v52 = vld [vmem:[%s1762_s1 + $0x1bc] ss:$20 sps:$4 sm:$0xff]   ;;  %v1326_v53 = vld [vmem:[%s1762_s1 + $0x1b8] ss:$20 sps:$4 sm:$0xff]   ;;  %v1330_v56 = vld [vmem:[%s1762_s1 + $0x194] ss:$20 sps:$4 sm:$0xff]  }
  0x13   :  { %599 = vmatpush1.bf16.msra.mxu1 %v1275_v18  ;;  %558 = vmatpush1.bf16.msra.mxu0 %v1278_v20  ;;  %v1327_v54 = vld [vmem:[%s1762_s1 + $0x19c] ss:$20 sps:$4 sm:$0xff]   ;;  %v1329_v55 = vld [vmem:[%s1762_s1 + $0x198] ss:$20 sps:$4 sm:$0xff]   ;;  %v1333_v58 = vld [vmem:[%s1762_s1 + $0x174] ss:$20 sps:$4 sm:$0xff]  }
  0x14   :  { %600 = vmatprep.subr.bf16.mxu1 %v1279_v19  ;;  %559 = vmatprep.subr.bf16.mxu0 %v1282_v21  ;;  %v1332_v57 = vld [vmem:[%s1762_s1 + $0x190] ss:$20 sps:$4 sm:$0xff]   ;;  %v1336_v60 = vld [vmem:[%s1762_s1 + $0x16c] ss:$20 sps:$4 sm:$0xff]   ;;  %v1338_v61 = vld [vmem:[%s1762_s1 + $0x168] ss:$20 sps:$4 sm:$0xff]  }
  0x15   :  { %622 = vmatprep.mubr.bf16.mxu1 %v36_v49  ;;  %581 = vmatprep.mubr.bf16.mxu0 %v36_v49  ;;  %v1335_v59 = vld [vmem:[%s1762_s1 + $0x170] ss:$20 sps:$4 sm:$0xff]   ;;  %v1339_v62 = vld [vmem:[%s1762_s1 + $0x14c] ss:$20 sps:$4 sm:$0xff]   ;;  %v1341_v63 = vld [vmem:[%s1762_s1 + $0x148] ss:$20 sps:$4 sm:$0xff]  }
  0x16   :  { %v1342_v0 = vld [vmem:[%s1762_s1 + $0x144] ss:$20 sps:$4 sm:$0xff]   ;;  %v1344_v1 = vld [vmem:[%s1762_s1 + $0x140] ss:$20 sps:$4 sm:$0xff]   ;;  %v1345_v4 = vld [vmem:[%s1762_s1 + $0x268] ss:$20 sps:$4 sm:$0xff]  }
  0x17   :  { %601 = vmatpush1.bf16.msra.mxu1 %v1281_v22  ;;  %560 = vmatpush1.bf16.msra.mxu0 %v1284_v24  ;;  %v31_v2 = vld [vmem:[%s1761_s0] sm:$0xff] }
  0x18   :  { %602 = vmatprep.subr.bf16.mxu1 %v1285_v23  ;;  %561 = vmatprep.subr.bf16.mxu0 %v1288_v25  ;;  %v35_v3 = vpack.c.bf16 %v31_v2, %v31_v2 }
  0x1b   :  { %603 = vmatpush1.bf16.msra.mxu1 %v1287_v26  ;;  %562 = vmatpush1.bf16.msra.mxu0 %v1290_v28 }
  0x1c   :  { %604 = vmatprep.subr.bf16.mxu1 %v1291_v27  ;;  %563 = vmatprep.subr.bf16.mxu0 %v1294_v29 }
  0x1f   :  { %605 = vmatpush1.bf16.msra.mxu1 %v1293_v30  ;;  %564 = vmatpush1.bf16.msra.mxu0 %v1296_v32 }
  0x20   :  { %606 = vmatprep.subr.bf16.mxu1 %v1297_v31  ;;  %565 = vmatprep.subr.bf16.mxu0 %v1300_v33 }
  0x23   :  { %607 = vmatpush2.bf16.msra.mxu1 %v1299_v34  ;;  %566 = vmatpush2.bf16.msra.mxu0 %v1302_v36 }
  0x24   :  { %608 = vmatprep.subr.bf16.mxu1 %v1303_v35  ;;  %567 = vmatprep.subr.bf16.mxu0 %v1306_v37 }
  0x27   :  { %609 = vmatpush2.bf16.msra.mxu1 %v1305_v38  ;;  %568 = vmatpush2.bf16.msra.mxu0 %v1308_v40 }
  0x28   :  { %610 = vmatprep.subr.bf16.mxu1 %v1309_v39  ;;  %569 = vmatprep.subr.bf16.mxu0 %v1312_v41 }
  0x2b   :  { %611 = vmatpush2.bf16.msra.mxu1 %v1311_v42  ;;  %570 = vmatpush2.bf16.msra.mxu0 %v1314_v44 }
  0x2c   :  { %612 = vmatprep.subr.bf16.mxu1 %v1315_v43  ;;  %571 = vmatprep.subr.bf16.mxu0 %v1318_v46 }
  0x2f   :  { %613 = vmatpush2.bf16.msra.mxu1 %v1317_v45  ;;  %572 = vmatpush2.bf16.msra.mxu0 %v1320_v48 }
  0x30   :  { %614 = vmatprep.subr.bf16.mxu1 %v1321_v50  ;;  %573 = vmatprep.subr.bf16.mxu0 %v1324_v52 }
  0x33   :  { %615 = vmatpush2.bf16.msra.mxu1 %v1323_v51  ;;  %574 = vmatpush2.bf16.msra.mxu0 %v1326_v53 }
  0x34   :  { %616 = vmatprep.subr.bf16.mxu1 %v1327_v54  ;;  %575 = vmatprep.subr.bf16.mxu0 %v1330_v56 }
  0x37   :  { %617 = vmatpush2.bf16.msra.mxu1 %v1329_v55  ;;  %576 = vmatpush2.bf16.msra.mxu0 %v1332_v57 }
  0x38   :  { %618 = vmatprep.subr.bf16.mxu1 %v1333_v58  ;;  %577 = vmatprep.subr.bf16.mxu0 %v1336_v60 }
  0x3b   :  { %619 = vmatpush2.bf16.msra.mxu1 %v1335_v59  ;;  %578 = vmatpush2.bf16.msra.mxu0 %v1338_v61 }
  0x3c   :  { %620 = vmatprep.subr.bf16.mxu1 %v1339_v62  ;;  %579 = vmatprep.subr.bf16.mxu0 %v1342_v0 }
  0x3d   :  { %13 = vsyncpa [#allocation3], 0  ;;  %v1346_v5 = vld [vmem:[%s1762_s1 + $0x128] ss:$20 sps:$4 sm:$0xff]   ;;  %v1347_v6 = vld [vmem:[%s1762_s1 + $0x240] ss:$20 sps:$4 sm:$0xff]  }
  0x3e   :  { %v1348_v7 = vld [vmem:[%s1762_s1 + $0x100] ss:$20 sps:$4 sm:$0xff]   ;;  %v1349_v8 = vld [vmem:[%s1762_s1 + $0x218] ss:$20 sps:$4 sm:$0xff]   ;;  %v1351_v10 = vld [vmem:[%s1762_s1 + $0x1f0] ss:$20 sps:$4 sm:$0xff]  }
  0x3f   :  { %621 = vmatpush2.bf16.msra.mxu1 %v1341_v63  ;;  %580 = vmatpush2.bf16.msra.mxu0 %v1344_v1  ;;  %v1350_v9 = vld [vmem:[%s1762_s1 + $0xd8] ss:$20 sps:$4 sm:$0xff]   ;;  %v1352_v11 = vld [vmem:[%s1762_s1 + $0xb0] ss:$20 sps:$4 sm:$0xff]   ;;  %v1353_v12 = vld [vmem:[%s1762_s1 + $0x1c8] ss:$20 sps:$4 sm:$0xff]  }
  0x40   :  { %1176 = vmatprep.subr.bf16.mxu0 %v1345_v4  ;;  %v1354_v13 = vld [vmem:[%s1762_s1 + $0x88] ss:$20 sps:$4 sm:$0xff]   ;;  %v1355_v14 = vld [vmem:[%s1762_s1 + $0x1a0] ss:$20 sps:$4 sm:$0xff]   ;;  %v1357_v16 = vld [vmem:[%s1762_s1 + $0x178] ss:$20 sps:$4 sm:$0xff]  }
  0x41   :  { %v1356_v15 = vld [vmem:[%s1762_s1 + $0x60] ss:$20 sps:$4 sm:$0xff]   ;;  %v1358_v17 = vld [vmem:[%s1762_s1 + $0x38] ss:$20 sps:$4 sm:$0xff]   ;;  %v1359_v18 = vld [vmem:[%s1762_s1 + $0x150] ss:$20 sps:$4 sm:$0xff]  }
  0x42   :  { %623 = vmatmul.mubr.bf16.vlgmr.msra.gmra.mxu1 %v35_v3  ;;  %582 = vmatmul.mubr.bf16.vlgmr.msra.gmra.mxu0 %v35_v3  ;;  %v1360_v19 = vld [vmem:[%s1762_s1 + $0x10] ss:$20 sps:$4 sm:$0xff]   ;;  %s1395_s13 = smov 64   ;;  %vm701_vm0 = vcmask 588800   ;;  %v1396_v28 = vmov 0   ;;  %v690_v30 = vld [vmem:[%s1767_s6 + $0x8] sm:$0xff] }
  0x43   :  { %1177 = vmatpush3.bf16.msra.mxu0 %v1346_v5  ;;  %663 = vmatprep.mubr.bf16.mxu0 %v36_v49  ;;  %v687_v25 = vld [vmem:[%s1763_s2] sm:$0xff]  ;;  %v788_v32 = vld [vmem:[%s1768_s7 + $0x8] sm:$0xff]  ;;  %vm799_vm1 = vcmask 130048   ;;  %v1363_v53 = vld [vmem:[%s1766_s5 + $0x34] ss:$8 sps:$4 sm:$0xff]   ;;  %v1397_v62 = vmov 0.0  }
  0x44   :  { %1178 = vmatprep.subr.bf16.mxu0 %v1347_v6  ;;  %1231 = vmatprep.mubr.msk.f32.mxu1 %vm701_vm0, %v687_v25  ;;  %v689_v31 = vld [vmem:[%s1767_s6] sm:$0xff]  ;;  %v688_v43 = vld [vmem:[%s1763_s2 + $0x8] sm:$0xff]  ;;  %v1361_v55 = vld [vmem:[%s1766_s5 + $0x30] ss:$8 sps:$4 sm:$0xff]   ;;  %vm977_vm2 = vcmask 64512   ;;  %vm930_vm3 = vcmask 523264  }
  0x45   :  { %1248 = vset.pattern.permute.xlu1 %v1396_v28  ;;  %1247 = vset.pattern.permute.xlu0 %v1396_v28  ;;  %v787_v33 = vld [vmem:[%s1768_s7] sm:$0xff]  ;;  %v786_v54 = vld [vmem:[%s1765_s4 + $0x8] sm:$0xff]  ;;  %v1369_v58 = vld [vmem:[%s1766_s5 + $0x14] ss:$8 sps:$4 sm:$0xff]  }
  0x46   :  { %v785_v44 = vld [vmem:[%s1765_s4] sm:$0xff]  ;;  %v1367_v59 = vld [vmem:[%s1766_s5 + $0x10] ss:$8 sps:$4 sm:$0xff]   ;;  %v34_v0 = vld [vmem:[%s1764_s3 + $0x8] sm:$0xff] }
  0x47   :  { %1179 = vmatpush3.bf16.msra.mxu0 %v1348_v7  ;;  %v1366_v56 = vld [vmem:[%s1766_s5 + $0x24] ss:$8 sps:$4 sm:$0xff]   ;;  %v1364_v57 = vld [vmem:[%s1766_s5 + $0x20] ss:$8 sps:$4 sm:$0xff]  }
  0x48   :  { %1180 = vmatprep.subr.bf16.mxu0 %v1349_v8  ;;  %v1372_v60 = vld [vmem:[%s1766_s5 + $0x4] ss:$8 sps:$4 sm:$0xff]   ;;  %v1370_v61 = vld [vmem:[%s1766_s5] ss:$8 sps:$4 sm:$0xff]   ;;  %s1398_s5 = smov [#allocation2]  }
  0x49   :  { %v33_v63 = vld [vmem:[%s1764_s3] sm:$0xff]  ;;  %s1070_s3 = sshll.u32 %s1398_s5, 4  ;;  %s1071_s3 = int_to_ptr.vmem [resolvable:$true] %s1070_s3 }
  0x4a   :  { %s1373_s21 = scalar_lea.vmem %s1071_s3, 512  ;;  %p1378_p1 = scmp.lt.s32.totalorder %s1071_s3, %s1071_s3 }
  0x4b   :  { %1181 = vmatpush3.bf16.msra.mxu0 %v1350_v9  ;;  %p1374_p0 = scmp.ne.s32.totalorder %s1071_s3, %s1373_s21  ;;  %p1379_p2 = scmp.lt.s32.totalorder %s1373_s21, %s1373_s21 }
  0x4c   :  { %1182 = vmatprep.subr.bf16.mxu0 %v1351_v10 }
  0x4d   :  { %p1380_p3 = por %p1379_p2, %p1378_p1 }
  0x4f   :  { %1183 = vmatpush3.bf16.msra.mxu0 %v1352_v11  ;;  %p1381_p4 = pnand %p1380_p3, %p1374_p0 }
  0x50   :  { %1184 = vmatprep.subr.bf16.mxu0 %v1353_v12 }
  0x53   :  { %1185 = vmatpush3.bf16.msra.mxu0 %v1354_v13 }
  0x54   :  { %1186 = vmatprep.subr.bf16.mxu0 %v1355_v14 }
  0x57   :  { %1187 = vmatpush3.bf16.msra.mxu0 %v1356_v15 }
  0x58   :  { %1188 = vmatprep.subr.bf16.mxu0 %v1357_v16 }
  0x5b   :  { %1189 = vmatpush3.bf16.msra.mxu0 %v1358_v17 }
  0x5c   :  { %1190 = vmatprep.subr.bf16.mxu0 %v1359_v18 }
  0x5f   :  { %1191 = vmatpush3.bf16.msra.mxu0 %v1360_v19 }
  0x60   :  { %1014 = vmatprep.subr.mxu0 %v1590_v47 }
  0x62   :  { %664 = vmatmul.mubr.bf16.vlgmr.msra.gmra.mxu0 %v35_v3 }
  0x63   :  { %1015 = vmatpush1.msra.mxu0 %v31_v2  ;;  %1048 = vmatprep.mubr.f32.mxu0 %v1397_v62 }
  0x6a   :  { %1174 = vmatmul.mubr.msk.f32.vlgmr.msra.gmra.mxu0 %vm977_vm2, %v33_v63 }
  0x6b   :  { %1054 = vmatprep.mubr.f32.mxu0 %v1397_v62 }
  0x6e   :  { %1175 = vmatmul.mubr.msk.f32.gmra.mxu0 %vm977_vm2, %v34_v0 }
 0x102   :  { %v624_v20 = vpop.f32.mrf.mxu1  ;;  %v583_v21 = vpop.f32.mrf.mxu0 }
 0x104   :  { %v626_v22 = vpop.f32.mrf.mxu1  ;;  %v585_v23 = vpop.f32.mrf.mxu0 }
 0x105   :  { %684 = vrot.lane.b32.xlu0 %v626_v22, %s1395_s13  ;;  %676 = vrot.lane.b32.xlu1 %v585_v23, %s1395_s13 }
 0x106   :  { %v628_v24 = vpop.f32.mrf.mxu1  ;;  %v587_v26 = vpop.f32.mrf.mxu0 }
 0x108   :  { %v629_v27 = vpop.f32.mrf.mxu1  ;;  %v588_v29 = vpop.f32.mrf.mxu0 }
 0x109   :  { %680 = vrot.lane.b32.xlu0 %v624_v20, %s1395_s13  ;;  %672 = vrot.lane.b32.xlu1 %v583_v21, %s1395_s13 }
 0x10d   :  { %698 = vperm.xlu0 %1247, %v690_v30   ;;  %693 = vperm.xlu1 %1248, %v689_v31  }
 0x111   :  { %796 = vperm.xlu0 %1247, %v788_v32   ;;  %791 = vperm.xlu1 %1248, %v787_v33  }
 0x122   :  { %v1192_v34 = vpop.f32.mrf.mxu0 }
 0x124   :  { %v1193_v35 = vpop.f32.mrf.mxu0 }
 0x125   :  { %v1194_v36 = vadd.f32 %v1193_v35, %v1192_v34 }
 0x126   :  { %v1195_v37 = vpop.f32.mrf.mxu0 }
 0x127   :  { %1213 = vmatprep.subr.mxu1 %v1194_v36 }
 0x128   :  { %v1196_v38 = vpop.f32.mrf.mxu0  ;;  %1214 = vmatpush3.msra.mxu1 %v1194_v36 }
 0x12a   :  { %v1050_v8 = vpop.f32.mrf.mxu0 }
 0x12c   :  { %v1052_v9 = vpop.f32.mrf.mxu0 }
 0x12e   :  { %v1056_v13 = vpop.f32.mrf.mxu0 }
 0x130   :  { %v1058_v17 = vpop.f32.mrf.mxu0 }
 0x177   :  { %v685_v39 = vpop.permute.xlu0 %684  ;;  %v677_v41 = vpop.permute.xlu1 %676 }
 0x178   :  { %1215 = vmatprep.subr.mxu1 %v685_v39 }
 0x179   :  { %1216 = vmatpush3.msra.mxu1 %v685_v39 }
 0x17a   :  { %1217 = vmatprep.subr.mxu1 %v626_v22 }
 0x17b   :  { %v681_v40 = vpop.permute.xlu0 %680  ;;  %1218 = vmatpush3.msra.mxu1 %v626_v22  ;;  %v673_v42 = vpop.permute.xlu1 %672 }
 0x17c   :  { %1219 = vmatprep.subr.mxu1 %v681_v40 }
 0x17d   :  { %1220 = vmatpush3.msra.mxu1 %v681_v40 }
 0x17e   :  { %1221 = vmatprep.subr.mxu1 %v624_v20 }
 0x17f   :  { %1222 = vmatpush3.msra.mxu1 %v624_v20 }
 0x180   :  { %1223 = vmatprep.subr.mxu1 %v677_v41 }
 0x181   :  { %1224 = vmatpush3.msra.mxu1 %v677_v41 }
 0x182   :  { %1225 = vmatprep.subr.mxu1 %v585_v23 }
 0x183   :  { %1226 = vmatpush3.msra.mxu1 %v585_v23 }
 0x184   :  { %1227 = vmatprep.subr.mxu1 %v673_v42 }
 0x185   :  { %1228 = vmatpush3.msra.mxu1 %v673_v42 }
 0x186   :  { %1229 = vmatprep.subr.mxu1 %v583_v21 }
 0x187   :  { %1230 = vmatpush3.msra.mxu1 %v583_v21 }
 0x188   :  { %1232 = vmatmul.mubr.msk.f32.vlgmr.msra.gmra.mxu1 %vm701_vm0, %v688_v43  ;;  %v699_v45 = vpop.permute.xlu0 %698  ;;  %v694_v48 = vpop.permute.xlu1 %693 }
 0x189   :  { %1238 = vmatprep.mubr.msk.f32.mxu1 %vm799_vm1, %v785_v44 }
 0x18c   :  { %v797_v2 = vpop.permute.xlu0 %796  ;;  %v792_v3 = vpop.permute.xlu1 %791 }
 0x248   :  { %v1233_v46 = vpop.f32.mrf.mxu1 }
 0x249   :  { %v780_v47 = vadd.f32 %v1233_v46, %v699_v45 }
 0x24a   :  { %v774_v49 = vpop.f32.mrf.mxu1 }
 0x24b   :  { %v784_v50 = vmax.f32 %v780_v47, 0.0  ;;  %v775_v51 = vadd.f32 %v774_v49, %v694_v48 }
 0x24d   :  { %v783_v52 = vmax.f32 %v775_v51, 0.0  ;;  %1234 = vmatprep.subr.mxu1 %v784_v50 }
 0x24e   :  { %1235 = vmatpush3.msra.mxu1 %v784_v50 }
 0x24f   :  { %1236 = vmatprep.subr.mxu1 %v783_v52 }
 0x250   :  { %1237 = vmatpush3.msra.mxu1 %v783_v52 }
 0x251   :  { %1239 = vmatmul.mubr.msk.f32.vlgmr.msra.gmra.mxu1 %vm799_vm1, %v786_v54  ;;  %942 = vmatprep.subr.bf16.mxu1 %v1363_v53 }
 0x252   :  { %943 = vmatpush1.bf16.msra.mxu1 %v1361_v55  ;;  %966 = vmatprep.mubr.bf16.mxu1 %v1396_v28 }
 0x253   :  { %944 = vmatprep.subr.bf16.mxu1 %v1366_v56 }
 0x256   :  { %945 = vmatpush1.bf16.msra.mxu1 %v1364_v57 }
 0x257   :  { %946 = vmatprep.subr.bf16.mxu1 %v1369_v58 }
 0x25a   :  { %947 = vmatpush1.bf16.msra.mxu1 %v1367_v59 }
 0x25b   :  { %948 = vmatprep.subr.bf16.mxu1 %v1372_v60 }
 0x25e   :  { %949 = vmatpush1.bf16.msra.mxu1 %v1370_v61 }
 0x311   :  { %v1240_v1 = vpop.f32.mrf.mxu1 }
 0x312   :  { %v878_v5 = vadd.f32 %v1240_v1, %v797_v2 }
 0x313   :  { %v872_v4 = vpop.f32.mrf.mxu1 }
 0x314   :  { %v873_v6 = vadd.f32 %v872_v4, %v792_v3 }
 0x316   :  { %v881_v7 = vpack.c.bf16 %v878_v5, %v873_v6 }
 0x318   :  { %1173 = vmatmul.mubr.msk.bf16.vlgmr.msra.gmra.mxu1 %vm930_vm3, %v881_v7 }
 0x3d8   :  { %v968_v10 = vpop.f32.mrf.mxu1 }
 0x3d9   :  { %v1051_v11 = vadd.f32 %v1050_v8, %v968_v10 }
 0x3da   :  { %v970_v12 = vpop.f32.mrf.mxu1 }
 0x3db   :  { %1061 = vst [vmem:[#allocation2] sm:$0xff] %v1051_v11  ;;  %v1053_v14 = vadd.f32 %v1052_v9, %v970_v12 }
 0x3dc   :  { %v972_v15 = vpop.f32.mrf.mxu1 }
 0x3dd   :  { %1062 = vst [vmem:[#allocation2 + $0x8] sm:$0xff] %v1053_v14  ;;  %v1057_v16 = vadd.f32 %v1056_v13, %v972_v15 }
 0x3de   :  { %v974_v18 = vpop.f32.mrf.mxu1 }
 0x3df   :  { %1063 = vst [vmem:[#allocation2 + $0x10] sm:$0xff] %v1057_v16  ;;  %v1059_v19 = vadd.f32 %v1058_v17, %v974_v18 }
 0x3e1   :  { %1064 = vst [vmem:[#allocation2 + $0x18] sm:$0xff] %v1059_v19 }
 0x3e2   :  { %1384 = shalt.err (!%p1381_p4)
}
 0x3e3   :  { %s1399_s22 = smov 256   ;;  %s1400_s6 = smov 16  }
 0x3e4   :  { %1076 = dma.vmem_to_hbm [thread:$0]  %s1071_s3, 512, %s1769_s8, [#allocation3], %s1399_s22, %s1399_s22, %s1400_s6  }
 0x3e5   :  { %1393 = dma.done.wait [#allocation3], 512  }
 0x3e6   :  { %1394 = vsyncadd [#allocation3], 4294966784 }
 0x3e7   :  { %1080 = vsyncpa [#allocation3], 1 }

</bundles_post_ra>
